<compile_context>
chip_gen: v5e
topology: v5e:2x2
jax: 0.10.0
libtpu: 0.0.40
codegen_flags: <defaults>
</compile_context>

<pallas_src>
import jax
import jax.numpy as jnp
import numpy as np
from jax.experimental import pallas as pl
from jax.experimental.pallas import tpu as pltpu


# ---------------------------------------------------------------------------
# Fused MHA kernel: one (batch b, head h) grid step.
#   x_ref:    (T, E)     bf16  -- resident across the h axis (index map ignores h)
#   wqkv_ref: (3, E, Dh) bf16  -- head h's [Q|K|V] projection (dk folded into Q)
#   wout_ref: (Dh, E)    bf16  -- head h's slice of the output projection
#   o_ref:    (T, E)     f32   -- resident across h, accumulated; one lane-dense
#                                 HBM writeback per batch element
# ---------------------------------------------------------------------------
def _mha_fused_kernel(x_ref, wqkv_ref, wout_ref, o_ref):
    h = pl.program_id(1)

    @pl.when(h == 0)
    def _init():
        o_ref[...] = jnp.zeros_like(o_ref)

    x = x_ref[...]                                                    # (T, E) bf16

    # Per-head projections on the MXU, f32 accumulation.
    q = jnp.dot(x, wqkv_ref[0], preferred_element_type=jnp.float32)  # (T, Dh) (dk pre-folded)
    k = jnp.dot(x, wqkv_ref[1], preferred_element_type=jnp.float32)  # (T, Dh)
    v = jnp.dot(x, wqkv_ref[2], preferred_element_type=jnp.float32)  # (T, Dh)

    # energy = (q * dk) @ k^T   -- dk already folded into the Q weight slab.
    energy = jax.lax.dot_general(
        q.astype(jnp.bfloat16), k.astype(jnp.bfloat16),
        dimension_numbers=(((1,), (1,)), ((), ())),                  # no explicit .T
        preferred_element_type=jnp.float32,
    )                                                                 # (T, T) f32

    # Softmax kept in f32 (safe on v5e too); EUP reciprocal + one Newton step.
    m = jnp.max(energy, axis=-1, keepdims=True)
    p = jnp.exp(energy - m)
    s = jnp.sum(p, axis=-1, keepdims=True)
    inv = pl.reciprocal(s, approx=True)
    inv = inv * (2.0 - s * inv)
    attn = (p * inv).astype(jnp.bfloat16)                             # bf16 probs for PV matmul

    o_h = jnp.dot(attn, v.astype(jnp.bfloat16),
                  preferred_element_type=jnp.float32)                 # (T, Dh) f32

    # Fused output projection: accumulate this head's (T, E) contribution.
    o_ref[...] += jnp.dot(o_h.astype(jnp.bfloat16), wout_ref[...],
                          preferred_element_type=jnp.float32)


# ---------------------------------------------------------------------------
# One-time (parameter-load-time) weight relayout.
#   w_qkv: (3E, E) nn.Linear layout (y = x @ W.T); output-channel order is
#          (d, k, h) per the einops pattern 'b t (d k h) -> k b h t d'.
#   w_out: (E, E)  nn.Linear layout.
# Returns:
#   wqkv_slabs: (H, 3, E, Dh) bf16, dk = sqrt(Dh) folded into the Q slab.
#   wout_slabs: (H, Dh, E)    bf16, per-head slice of the output projection.
# ---------------------------------------------------------------------------
def prepare_mha_params(w_qkv, w_out, head_num, compute_dtype=jnp.bfloat16):
    E3, E = w_qkv.shape
    assert E3 == 3 * E and E % head_num == 0
    H = head_num
    Dh = E // H
    dk = float(Dh) ** 0.5  # the module MULTIPLIES by dk

    w = w_qkv.astype(jnp.float32).reshape(Dh, 3, H, E)   # rows ordered (d, k, h)
    w = jnp.transpose(w, (2, 1, 3, 0))                   # (H, 3, E, Dh)
    w = w.at[:, 0].multiply(dk)                          # fold dk into the Q slab
    wqkv_slabs = w.astype(compute_dtype)

    wo = w_out.astype(jnp.float32).reshape(E, H, Dh)     # (j, h, d)
    wout_slabs = jnp.transpose(wo, (1, 2, 0)).astype(compute_dtype)  # (H, Dh, E)
    return wqkv_slabs, wout_slabs


# ---------------------------------------------------------------------------
# Forward: single fused pallas_call over grid (B, H).
# ---------------------------------------------------------------------------
def multi_head_attention(x, wqkv_slabs, wout_slabs):
    B, T, E = x.shape
    H, three, E_w, Dh = wqkv_slabs.shape
    assert three == 3 and E_w == E and H * Dh == E

    x_c = x.astype(wqkv_slabs.dtype)  # bf16 at the pallas_call boundary

    cost = pl.CostEstimate(
        flops=2 * B * T * E * 3 * E + 4 * B * H * T * T * Dh + 2 * B * T * E * E,
        transcendentals=B * H * T * T,
        bytes_accessed=2 * B * T * E + 2 * B * (3 * E * E + E * E) + 4 * B * T * E,
    )

    return pl.pallas_call(
        _mha_fused_kernel,
        out_shape=jax.ShapeDtypeStruct((B, T, E), jnp.float32),
        grid=(B, H),
        in_specs=[
            # x: full (T, E) block, constant across h -> loaded once per b.
            pl.BlockSpec((None, T, E), lambda b, h: (b, 0, 0)),
            # per-head QKV slabs (3, E, Dh); full last-two dims (lane-dense).
            pl.BlockSpec((None, 3, E, Dh), lambda b, h: (h, 0, 0, 0)),
            # per-head output-projection slab (Dh, E).
            pl.BlockSpec((None, Dh, E), lambda b, h: (h, 0, 0)),
        ],
        # Output block resident across h (accumulator); one writeback per b.
        out_specs=pl.BlockSpec((None, T, E), lambda b, h: (b, 0, 0)),
        compiler_params=pltpu.CompilerParams(
            dimension_semantics=("parallel", "arbitrary"),  # B parallel, H reduction
            vmem_limit_bytes=48 * 1024 * 1024,
        ),
        cost_estimate=cost,
    )(x_c, wqkv_slabs, wout_slabs)


# ---------------------------------------------------------------------------
# Pure-JAX reference (mirrors the PyTorch forward) for verification.
# ---------------------------------------------------------------------------
def reference(x, w_qkv, w_out, head_num):
    B, T, E = x.shape
    H = head_num
    Dh = E // H
    dk = float(Dh) ** 0.5
    qkv = x @ w_qkv.T
    qkv = qkv.reshape(B, T, Dh, 3, H)               # channel order (d, k, h)
    qkv = jnp.transpose(qkv, (3, 0, 4, 1, 2))       # (k, B, H, T, Dh)
    q, k, v = qkv[0], qkv[1], qkv[2]
    energy = jnp.einsum("bhid,bhjd->bhij", q, k) * dk
    attn = jax.nn.softmax(energy, axis=-1)
    o = jnp.einsum("bhij,bhjd->bhid", attn, v)
    o = jnp.transpose(o, (0, 2, 1, 3)).reshape(B, T, E)
    return o @ w_out.T


if __name__ == "__main__":
    B, T, E, H = 2, 8, 32, 4  # batch, tokens, embedding_dim, head_num

    key = jax.random.PRNGKey(0)
    kx, kq, ko = jax.random.split(key, 3)
    x = jax.random.normal(kx, (B, T, E), dtype=jnp.float32)
    # nn.Linear(E, 3E, bias=False) -> weight (3E, E)
    w_qkv = jax.random.normal(kq, (3 * E, E), dtype=jnp.float32) * 0.05
    # nn.Linear(E, E, bias=False) -> weight (E, E)
    w_out = jax.random.normal(ko, (E, E), dtype=jnp.float32) * 0.05

    # One-time weight relayout (einops shuffle + dk scale folded in, bf16 cast).
    wqkv_slabs, wout_slabs = prepare_mha_params(w_qkv, w_out, H)

    out = jax.block_until_ready(multi_head_attention(x, wqkv_slabs, wout_slabs))

    ref = reference(x, w_qkv, w_out, H)
    # bf16 matmul operands (f32 accumulation / f32 softmax) -> bf16-level tolerance.
    np.testing.assert_allclose(np.asarray(out), np.asarray(ref), rtol=2e-2, atol=2e-2)

    print("KERNEL_OK")
</pallas_src>

<mosaic_0001>
module attributes {stable_mosaic.version = 11 : i64} {
  func.func @_mha_fused_kernel(%arg0: i32, %arg1: i32, %arg2: memref<1x8x32xbf16, #tpu.memory_space<vmem>>, %arg3: memref<1x3x32x8xbf16, #tpu.memory_space<vmem>>, %arg4: memref<1x8x32xbf16, #tpu.memory_space<vmem>>, %arg5: memref<1x8x32xf32, #tpu.memory_space<vmem>>) attributes {dimension_semantics = [#tpu.dimension_semantics<parallel>, #tpu.dimension_semantics<arbitrary>], iteration_bounds = array<i64: 2, 4>, scalar_prefetch = 0 : i64, scratch_operands = 0 : i64, tpu.core_type = #tpu.core_type<tc>, window_params = [{transform_indices = @transform_0, window_bounds = array<i64: 1, 8, 32>}, {transform_indices = @transform_1, window_bounds = array<i64: 1, 3, 32, 8>}, {transform_indices = @transform_2, window_bounds = array<i64: 1, 8, 32>}, {transform_indices = @transform_3, window_bounds = array<i64: 1, 8, 32>}]} {
    %c0_i32 = arith.constant 0 : i32
    %0 = arith.cmpi eq, %arg1, %c0_i32 : i32
    %1 = arith.extui %0 : i1 to i32
    %c0_i32_0 = arith.constant 0 : i32
    %2 = arith.cmpi ne, %1, %c0_i32_0 : i32
    scf.if %2 {
      %cst_30 = arith.constant 0.000000e+00 : f32
      %44 = vector.broadcast %cst_30 : f32 to vector<8x32xf32>
      %c0_31 = arith.constant 0 : index
      %c0_32 = arith.constant 0 : index
      %c0_33 = arith.constant 0 : index
      %45 = vector.load %arg5[%c0_31, %c0_32, %c0_33] : memref<1x8x32xf32, #tpu.memory_space<vmem>>, vector<1x8x32xf32>
      %46 = vector.shape_cast %45 : vector<1x8x32xf32> to vector<8x32xf32>
      %47 = vector.shape_cast %44 : vector<8x32xf32> to vector<1x8x32xf32>
      tpu.vector_store %arg5[%c0_31, %c0_32, %c0_33], %47 {strides = array<i32>} : memref<1x8x32xf32, #tpu.memory_space<vmem>>, vector<1x8x32xf32>,
    } else {
    }
    %c0 = arith.constant 0 : index
    %c0_1 = arith.constant 0 : index
    %c0_2 = arith.constant 0 : index
    %3 = vector.load %arg2[%c0, %c0_1, %c0_2] : memref<1x8x32xbf16, #tpu.memory_space<vmem>>, vector<1x8x32xbf16>
    %4 = vector.shape_cast %3 : vector<1x8x32xbf16> to vector<8x32xbf16>
    %c0_3 = arith.constant 0 : index
    %c0_4 = arith.constant 0 : index
    %c0_5 = arith.constant 0 : index
    %c0_6 = arith.constant 0 : index
    %5 = vector.load %arg3[%c0_3, %c0_4, %c0_5, %c0_6] : memref<1x3x32x8xbf16, #tpu.memory_space<vmem>>, vector<1x1x32x8xbf16>
    %6 = vector.shape_cast %5 : vector<1x1x32x8xbf16> to vector<32x8xbf16>
    %cst = arith.constant dense<0.000000e+00> : vector<8x8xf32>
    %7 = tpu.matmul %4, %6, %cst {dimension_numbers = #tpu.dot_dimension_numbers<[1], [0], [0], [1], [0, 0, 1, 1], [], []>} : vector<8x32xbf16>, vector<32x8xbf16>, vector<8x8xf32> -> vector<8x8xf32>
    %c0_7 = arith.constant 0 : index
    %c1 = arith.constant 1 : index
    %c0_8 = arith.constant 0 : index
    %c0_9 = arith.constant 0 : index
    %8 = vector.load %arg3[%c0_7, %c1, %c0_8, %c0_9] : memref<1x3x32x8xbf16, #tpu.memory_space<vmem>>, vector<1x1x32x8xbf16>
    %9 = vector.shape_cast %8 : vector<1x1x32x8xbf16> to vector<32x8xbf16>
    %cst_10 = arith.constant dense<0.000000e+00> : vector<8x8xf32>
    %10 = tpu.matmul %4, %9, %cst_10 {dimension_numbers = #tpu.dot_dimension_numbers<[1], [0], [0], [1], [0, 0, 1, 1], [], []>} : vector<8x32xbf16>, vector<32x8xbf16>, vector<8x8xf32> -> vector<8x8xf32>
    %c0_11 = arith.constant 0 : index
    %c2 = arith.constant 2 : index
    %c0_12 = arith.constant 0 : index
    %c0_13 = arith.constant 0 : index
    %11 = vector.load %arg3[%c0_11, %c2, %c0_12, %c0_13] : memref<1x3x32x8xbf16, #tpu.memory_space<vmem>>, vector<1x1x32x8xbf16>
    %12 = vector.shape_cast %11 : vector<1x1x32x8xbf16> to vector<32x8xbf16>
    %cst_14 = arith.constant dense<0.000000e+00> : vector<8x8xf32>
    %13 = tpu.matmul %4, %12, %cst_14 {dimension_numbers = #tpu.dot_dimension_numbers<[1], [0], [0], [1], [0, 0, 1, 1], [], []>} : vector<8x32xbf16>, vector<32x8xbf16>, vector<8x8xf32> -> vector<8x8xf32>
    %14 = arith.truncf %7 : vector<8x8xf32> to vector<8x8xbf16>
    %15 = arith.truncf %10 : vector<8x8xf32> to vector<8x8xbf16>
    %cst_15 = arith.constant dense<0.000000e+00> : vector<8x8xf32>
    %16 = tpu.matmul %14, %15, %cst_15 {dimension_numbers = #tpu.dot_dimension_numbers<[1], [1], [0], [0], [0, 0, 1, 0], [], []>} : vector<8x8xbf16>, vector<8x8xbf16>, vector<8x8xf32> -> vector<8x8xf32>
    %cst_16 = arith.constant dense<0xFF800000> : vector<8xf32>
    %17 = vector.multi_reduction <maximumf>, %16, %cst_16 [1] : vector<8x8xf32> to vector<8xf32>
    %18 = vector.shape_cast %17 : vector<8xf32> to vector<8x1xf32>
    %19 = vector.broadcast %18 : vector<8x1xf32> to vector<8x8xf32>
    %20 = arith.subf %16, %19 : vector<8x8xf32>
    %21 = math.exp %20 : vector<8x8xf32>
    %cst_17 = arith.constant dense<0.000000e+00> : vector<8xf32>
    %22 = vector.multi_reduction <add>, %21, %cst_17 [1] : vector<8x8xf32> to vector<8xf32>
    %23 = vector.shape_cast %22 : vector<8xf32> to vector<8x1xf32>
    %24 = tpu.reciprocal %23 {approx = true} : vector<8x1xf32> -> vector<8x1xf32>
    %25 = arith.mulf %23, %24 : vector<8x1xf32>
    %cst_18 = arith.constant 2.000000e+00 : f32
    %26 = vector.broadcast %cst_18 : f32 to vector<8x1xf32>
    %27 = arith.subf %26, %25 : vector<8x1xf32>
    %28 = arith.mulf %24, %27 : vector<8x1xf32>
    %29 = vector.broadcast %28 : vector<8x1xf32> to vector<8x8xf32>
    %30 = arith.mulf %21, %29 : vector<8x8xf32>
    %31 = arith.truncf %30 : vector<8x8xf32> to vector<8x8xbf16>
    %32 = arith.truncf %13 : vector<8x8xf32> to vector<8x8xbf16>
    %cst_19 = arith.constant dense<0.000000e+00> : vector<8x8xf32>
    %33 = tpu.matmul %31, %32, %cst_19 {dimension_numbers = #tpu.dot_dimension_numbers<[1], [0], [0], [1], [0, 0, 1, 1], [], []>} : vector<8x8xbf16>, vector<8x8xbf16>, vector<8x8xf32> -> vector<8x8xf32>
    %c0_20 = arith.constant 0 : index
    %c0_21 = arith.constant 0 : index
    %c0_22 = arith.constant 0 : index
    %34 = vector.load %arg5[%c0_20, %c0_21, %c0_22] : memref<1x8x32xf32, #tpu.memory_space<vmem>>, vector<1x8x32xf32>
    %35 = vector.shape_cast %34 : vector<1x8x32xf32> to vector<8x32xf32>
    %36 = arith.truncf %33 : vector<8x8xf32> to vector<8x8xbf16>
    %c0_23 = arith.constant 0 : index
    %c0_24 = arith.constant 0 : index
    %c0_25 = arith.constant 0 : index
    %37 = vector.load %arg4[%c0_23, %c0_24, %c0_25] : memref<1x8x32xbf16, #tpu.memory_space<vmem>>, vector<1x8x32xbf16>
    %38 = vector.shape_cast %37 : vector<1x8x32xbf16> to vector<8x32xbf16>
    %cst_26 = arith.constant dense<0.000000e+00> : vector<8x32xf32>
    %39 = tpu.matmul %36, %38, %cst_26 {dimension_numbers = #tpu.dot_dimension_numbers<[1], [0], [0], [1], [0, 0, 1, 1], [], []>} : vector<8x8xbf16>, vector<8x32xbf16>, vector<8x32xf32> -> vector<8x32xf32>
    %40 = arith.addf %35, %39 : vector<8x32xf32>
    %c0_27 = arith.constant 0 : index
    %c0_28 = arith.constant 0 : index
    %c0_29 = arith.constant 0 : index
    %41 = vector.load %arg5[%c0_27, %c0_28, %c0_29] : memref<1x8x32xf32, #tpu.memory_space<vmem>>, vector<1x8x32xf32>
    %42 = vector.shape_cast %41 : vector<1x8x32xf32> to vector<8x32xf32>
    %43 = vector.shape_cast %40 : vector<8x32xf32> to vector<1x8x32xf32>
    tpu.vector_store %arg5[%c0_27, %c0_28, %c0_29], %43 {strides = array<i32>} : memref<1x8x32xf32, #tpu.memory_space<vmem>>, vector<1x8x32xf32>,
    return
  }
  func.func @transform_0(%arg0: i32, %arg1: i32) -> (i32, i32, i32) {
    %c0_i32 = arith.constant 0 : i32
    %c0_i32_0 = arith.constant 0 : i32
    %c0_i32_1 = arith.constant 0 : i32
    return %arg0, %c0_i32, %c0_i32_0 : i32, i32, i32
  }
  func.func @transform_1(%arg0: i32, %arg1: i32) -> (i32, i32, i32, i32) {
    %c0_i32 = arith.constant 0 : i32
    %c0_i32_0 = arith.constant 0 : i32
    %c0_i32_1 = arith.constant 0 : i32
    %c0_i32_2 = arith.constant 0 : i32
    return %arg1, %c0_i32, %c0_i32_0, %c0_i32_1 : i32, i32, i32, i32
  }
  func.func @transform_2(%arg0: i32, %arg1: i32) -> (i32, i32, i32) {
    %c0_i32 = arith.constant 0 : i32
    %c0_i32_0 = arith.constant 0 : i32
    %c0_i32_1 = arith.constant 0 : i32
    return %arg1, %c0_i32, %c0_i32_0 : i32, i32, i32
  }
  func.func @transform_3(%arg0: i32, %arg1: i32) -> (i32, i32, i32) {
    %c0_i32 = arith.constant 0 : i32
    %c0_i32_0 = arith.constant 0 : i32
    %c0_i32_1 = arith.constant 0 : i32
    return %arg0, %c0_i32, %c0_i32_0 : i32, i32, i32
  }
}

</mosaic_0001>

<bundles_post_ra>
// kernel: tpu_custom_call.1
= control target key start
LH: loop header
LB: loop body
LE: loop exit
PB: predicated region body
PF: predicated region fallthrough
CT: control target
= control target key end

     0   :  { %8 = vsyncpa [#allocation3], 0  ;;  %s917_s0 = inlined_call_operand.vmem [shape: bf16[2,8,32], index: 0, kind: input, shape index: {}]   ;;  %s918_s1 = inlined_call_operand.vmem [shape: bf16[4,3,32,8], index: 1, kind: input, shape index: {}]   ;;  %s919_s2 = inlined_call_operand.vmem [shape: bf16[4,8,32], index: 2, kind: input, shape index: {}]   ;;  %s920_s3 = inlined_call_operand.hbm [shape: f32[2,8,32], index: 3, kind: output, shape index: {}]  }
   0x1   :  { %10 = vsyncpa [#allocation3 + $0x1], 0  ;;  %s760_s12 = smov 0   ;;  %s762_s13 = smov 0  }
   0x2   :  { %s764_s14 = smov 0   ;;  %s766_s15 = smov 0  }
   0x3   :  { %s768_s16 = smov 0   ;;  %s770_s17 = smov 0  }
   0x4   :  { %s772_s18 = smov 0   ;;  %s774_s19 = smov 0  }
   0x5 LB: > { %s508_s20 = sadd.s32 4294967295, %s737_s19   ;;  %s509_s21 = sadd.s32 4294967294, %s737_s19   ;;  %s737_s19 = sphi %s774_s19, %s16_s19   ;;  %s733_s18 = sphi %s772_s18, %s936_s18   ;;  %s729_s17 = sphi %s770_s17, %s935_s17   ;;  %s725_s16 = sphi %s768_s16, %s934_s16   ;;  %s721_s15 = sphi %s766_s15, %s933_s15   ;;  %s717_s14 = sphi %s764_s14, %s932_s14   ;;  %s713_s13 = sphi %s762_s13, %s931_s13   ;;  %s709_s12 = sphi %s760_s12, %s930_s12  }
   0x6   : > { %s25_s22 = sadd.s32 1, %s729_s17  ;;  %s28_s23 = sadd.s32 1, %s733_s18 }
   0x7   : > { %p26_p0 = scmp.ge.s32.totalorder %s25_s22, 4  ;;  %p123_p1 = scmp.ne.s32.totalorder %s717_s14, %s713_s13 }
   0x8   : > { %p124_p2 = scmp.eq.s32.totalorder %s508_s20, 7  ;;  %p129_p4 = scmp.ne.s32.totalorder %s713_s13, %s709_s12 }
   0x9   : > { %s938_s22 = smov (%p26_p0, %s25_s22), 0  ;;  %s940_s23 = smov (!%p26_p0, %s28_s23), %s733_s18 }
   0xa   : > { %923 = sst [smem:[#allocation5_spill]] %s938_s22  ;;  %p809_p3 = por %p124_p2, %p123_p1 }
   0xb   : > { %p30_p5 = scmp.ge.s32.totalorder %s940_s23, 2  ;;  %p130_p6 = scmp.eq.s32.totalorder %s509_s21, 7 }
   0xc   : > { %p512_p7 = scmp.ge.s32.totalorder %s737_s19, 1  ;;  %p170_p8 = scmp.lt.s32.totalorder %s737_s19, 9 }
   0xd   : > { %s942_s23 = smov (%p30_p5, %s940_s23), 0  ;;  %p819_p9 = por %p130_p6, %p129_p4 }
   0xe   : > { %925 = sst [smem:[#allocation6_spill]] %s942_s23  ;;  %p171_p10 = pnand %p512_p7, %p170_p8 }
   0xf   : > { %s110_s26 = ssub.s32 %s733_s18, %s942_s23  ;;  %s113_s27 = sadd.s32 1, %s717_s14 }
  0x10   : > { %p111_p11 = scmp.eq.s32.totalorder %s110_s26, 0  ;;  %174 = sbr.rel (%p171_p10) target bundleno = 830 (0x33e), region = 32 }
  0x11   : > { %s922_s29 = sand.u32 (!%p171_p10), 1, %s713_s13   ;;  %p202_p12 = scmp.lt.s32.totalorder (!%p171_p10), %s725_s16, 1 }
  0x12   : > { %s827_s28 = scalar_select %p111_p11, %s717_s14, %s113_s27  }
  0x13   : > { %s513_s30 = sshll.u32 (!%p171_p10), %s922_s29, 3  ;;  %p206_p13 = scmp.lt.s32.totalorder (!%p171_p10), %s721_s15, 3 }
  0x14   : > { %s849_s29 = scalar_lea.vmem (!%p171_p10), [#allocation2], %s513_s30  ;;  %p517_p0 = scmp.ne.s32.totalorder (!%p171_p10), %s721_s15, 0 }
  0x15   : > { %s203_s4 = scalar_select %p202_p12, %s725_s16, 1 }
  0x16   : > { %s207_s5 = scalar_select %p206_p13, %s721_s15, 3 }
  0x17   : > { %s514_s6 = sshll.u32 %s203_s4, 2  ;;  %219 = sbr.rel (%p517_p0) target bundleno = 30 (0x1e), region = 36 }
  0x18   : > { %s205_s9 = scalar_lea.vmem %s917_s0, %s514_s6  ;;  %s566_s10 = smul.u32 48, %s207_s5 }
  0x19   : > { %s516_s11 = sshll.u32 %s207_s5, 2 }
  0x1a   : > { %s842_s26 = scalar_lea.vmem %s918_s1, %s566_s10  ;;  %s847_s22 = scalar_lea.vmem %s919_s2, %s516_s11 }
  0x1c   : > { %vm220_vm0 = vcmask 261120   ;;  %v739_v0 = vmov 0.0  }
  0x1d   : > { %221 = vst.msk [vmem:[%s849_s29] sm:$0xff] %vm220_vm0, %v739_v0 }
  0x1e PF: > { %v561_v1 = vld [vmem:[%s842_s26 + $0x8] sm:$0xff]  ;;  %v563_v2 = vld [vmem:[%s842_s26 + $0x18] sm:$0xff]  ;;  %v560_v3 = vld [vmem:[%s842_s26] sm:$0xff]  ;;  %vm239_vm1 = vcmask 261120   ;;  %vm318_vm2 = vcmask 64512   ;;  %vm357_vm3 = vcmask 1043456  }
  0x1f   : > { %249 = vmatpush.bf16.msra.mxu0 %v561_v1  ;;  %279 = vmatpush.bf16.msra.mxu1 %v563_v2  ;;  %v562_v4 = vld [vmem:[%s842_s26 + $0x10] sm:$0xff]  ;;  %v222_v5 = vld [vmem:[%s205_s9] sm:$0xf]  ;;  %v565_v13 = vld [vmem:[%s842_s26 + $0x28] sm:$0xff]  ;;  %s557_s15 = sshll.u32 %s725_s16, 3  ;;  %s411_s4 = sshll.u32 %s849_s29, 4  ;;  %s412_s4 = int_to_ptr.vmem [resolvable:$true] %s411_s4 }
  0x20   : > { %309 = vmatpush.bf16.msra.mxu2 %v565_v13  ;;  %v564_v14 = vld [vmem:[%s842_s26 + $0x20] sm:$0xff]  ;;  %s409_s30 = scalar_lea.hbm %s920_s3, %s557_s15  ;;  %s927_s6 = sand.u32 1, %s713_s13  }
  0x21   : > { %v376_v27 = vld [vmem:[%s847_s22] sm:$0xf]  ;;  %s413_s5 = sshll.u32 %s409_s30, 4  ;;  %s399_s7 = scalar_lea.sflag [#allocation3], %s927_s6  ;;  %s414_s5 = int_to_ptr.hbm [resolvable:$true] %s413_s5 }
  0x22   : > { %v381_v28 = vsel %vm357_vm3, %v376_v27, 0  ;;  %s657_s8 = sshra.s32 %s414_s5, 4  ;;  %s663_s11 = scalar_lea.hbm %s920_s3, 16  ;;  %s658_s8 = int_to_ptr.hbm [resolvable:$true] %s657_s8 }
  0x23   : > { %250 = vmatpush.bf16.msra.mxu0 %v560_v3  ;;  %280 = vmatpush.bf16.msra.mxu1 %v562_v4  ;;  %s659_s9 = scalar_lea.hbm %s658_s8, 8  ;;  %p664_p5 = scmp.lt.s32.totalorder %s658_s8, %s920_s3 }
  0x24   : > { %310 = vmatpush.bf16.msra.mxu2 %v564_v14  ;;  %v374_v39 = vld [vmem:[%s849_s29] sm:$0xff]  ;;  %p660_p1 = scmp.ne.s32.totalorder %s658_s8, %s659_s9  ;;  %p665_p6 = scmp.lt.s32.totalorder %s663_s11, %s659_s9 }
  0x26   : > { %526 = vmatmul.msk.bf16.vlgmr.msra.gmra.mxu0 %vm239_vm1, %v222_v5  ;;  %539 = vmatmul.msk.bf16.vlgmr.msra.gmra.mxu1 %vm239_vm1, %v222_v5  ;;  %p661_p2 = pnand %p660_p1, %p809_p3  ;;  %p666_p7 = por %p665_p6, %p664_p5 }
  0x27   : > { %552 = vmatmul.msk.bf16.vlgmr.msra.gmra.mxu2 %vm239_vm1, %v222_v5  ;;  %390 = vmatpush.bf16.msrb.mxu1 %v381_v28 }
  0x28   : > { %p662_p4 = pneg %p661_p2 }
  0x2a   : > { %p667_p8 = pnand %p666_p7, %p662_p4 }
  0xa3   : > { %v252_v6 = vpop.f32.mrf.mxu0  ;;  %v282_v7 = vpop.f32.mrf.mxu1 }
  0xa4   : > { %v317_v8 = vpack.c.bf16 %v282_v7, %v282_v7  ;;  %v316_v10 = vpack.c.bf16 %v252_v6, %v252_v6 }
  0xa6   : > { %v323_v9 = vsel %vm318_vm2, %v317_v8, 0 }
  0xa7   : > { %332 = vmatpush.bf16.xpose.msra.mxu3 %v323_v9 }
  0xaa   : > { %v312_v18 = vpop.f32.mrf.mxu2 }
  0xab   : > { %v254_v11 = vpop.f32.mrf.mxu0  ;;  %v284_v12 = vpop.f32.mrf.mxu1  ;;  %v353_v25 = vpack.c.bf16 %v312_v18, %v312_v18 }
  0xad   : > { %v359_v26 = vsel %vm357_vm3, %v353_v25, 0 }
  0xae   : > { %553 = vmatmul.msk.bf16.vlgmr.msra.gmra.mxu3 %vm318_vm2, %v316_v10  ;;  %368 = vmatpush.bf16.msrb.mxu0 %v359_v26 }
  0xb2   : > { %v314_v22 = vpop.f32.mrf.mxu2 }
 0x131   : > { %v334_v15 = vpop.f32.mrf.mxu3 }
 0x132   : > { %v338_v16 = vsel %vm318_vm2, %v334_v15, -inf }
 0x133   : > { %339 = vmax.xlane.f32.xlu0 %v338_v16 }
 0x139   : > { %v336_v17 = vpop.f32.mrf.mxu3 }
 0x1a6   : > { %v340_v19 = vpop.xlane.xlu0 %339 }
 0x1a7   : > { %v341_v20 = vsub.f32 %v334_v15, %v340_v19 }
 0x1a9   : > { %v342_v21 = vmul.f32 1.442695, %v341_v20 }
 0x1ab   : > { %639 = vpow2.f32 %v342_v21 }
 0x1b1   : > { %v640_v23 = vpop.eup %639 }
 0x1b2   : > { %v344_v24 = vsel %vm318_vm2, %v640_v23, 0.0 }
 0x1b3   : > { %345 = vadd.xlane.f32.xlu0 %v344_v24 }
 0x226   : > { %v346_v29 = vpop.xlane.xlu0 %345 }
 0x227   : > { %641 = vrcp.f32 %v346_v29 }
 0x22d   : > { %v642_v30 = vpop.eup %641 }
 0x22e   : > { %v348_v31 = vmul.f32 %v642_v30, %v346_v29 }
 0x230   : > { %v349_v32 = vsub.f32 2.0, %v348_v31 }
 0x232   : > { %v350_v33 = vmul.f32 %v642_v30, %v349_v32 }
 0x234   : > { %v351_v34 = vmul.f32 %v640_v23, %v350_v33 }
 0x236   : > { %v352_v35 = vpack.c.bf16 %v351_v34, %v351_v34 }
 0x238   : > { %554 = vmatmul.msk.bf16.vlgmr.msrb.gmra.mxu0 %vm318_vm2, %v352_v35 }
 0x2b5   : > { %v370_v36 = vpop.f32.mrf.mxu0 }
 0x2b6   : > { %v375_v37 = vpack.c.bf16 %v370_v36, %v370_v36 }
 0x2b8   : > { %555 = vmatmul.msk.bf16.vlgmr.msrb.gmra.mxu1 %vm318_vm2, %v375_v37 }
 0x2bd   : > { %v372_v38 = vpop.f32.mrf.mxu0 }
 0x335   : > { %v392_v40 = vpop.f32.mrf.mxu1 }
 0x336   : > { %v396_v41 = vadd.f32 %v392_v40, %v374_v39 }
 0x338   : > { %397 = vst.msk [vmem:[%s849_s29] sm:$0xff] %vm239_vm1, %v396_v41 }
 0x339   : > { %670 = shalt.err (!%p667_p8)
}
 0x33a   : > { %567 = dma.vmem_to_hbm [thread:$0]  (%p809_p3), %s412_s4, 128, %s414_s5, %s399_s7  }
 0x33d   : > { %v394_v42 = vpop.f32.mrf.mxu1 }
 0x33e PF: > { %p573_p10 = scmp.ge.s32.totalorder %s737_s19, 2  ;;  %s425_s29 = sand.u32 1, %s709_s12  }
 0x33f   : > { %s426_s26 = scalar_lea.sflag [#allocation3], %s425_s29 }
 0x340   : > { %p570_p11 = pnand %p573_p10, %p819_p9 }
 0x342   : > { %p571_p12 = pneg %p570_p11 }
 0x344   : > { %704 = dma.done.wait (%p571_p12), %s426_s26, 128  }
 0x345   : > { %706 = vsyncadd (%p571_p12), %s426_s26, 4294967168  ;;  %s16_s19 = sadd.s32 1, %s737_s19   ;;  %s928_s24 = sld [smem:[#allocation5_spill]] }
 0x346   : > { %p13_p13 = scmp.ge.s32.totalorder %s16_s19, 10   ;;  %s929_s27 = sld [smem:[#allocation6_spill]] }
 0x347   : > { %s930_s12 = smov %s713_s13  ;;  %s931_s13 = smov %s717_s14 }
 0x348   : > { %s932_s14 = smov %s827_s28  ;;  %s933_s15 = smov %s729_s17 }
 0x349   : > { %s934_s16 = smov %s733_s18  ;;  %15 = sbr.rel (!%p13_p13) target bundleno = 5 (0x5), region = 79 }
 0x34b   : > { %s935_s17 = smov %s928_s24 }
 0x34c   : > { %s936_s18 = smov %s929_s27 }
 0x34e   :  { %432 = vsyncpa [#allocation3], 1 }
 0x34f   :  { %434 = vsyncpa [#allocation3 + $0x1], 1 }

</bundles_post_ra>
